<compile_context>
chip_gen: v7x
topology: tpu7x:2x2x1
jax: 0.10.0
libtpu: 0.0.40
codegen_flags: <defaults>
</compile_context>

<pallas_src>
import functools
import itertools

import numpy as np
import jax
import jax.numpy as jnp
from jax import lax
from jax.experimental import pallas as pl
from jax.experimental.pallas import tpu as pltpu

try:  # host-side Hungarian solver (optional)
    from scipy.optimize import linear_sum_assignment as _linear_sum_assignment
except Exception:  # pragma: no cover
    _linear_sum_assignment = None

_VMEM = pl.BlockSpec(memory_space=pltpu.MemorySpace.VMEM)


# --------------------------------------------------------------------------------------
# Pallas kernels
# --------------------------------------------------------------------------------------
def _cost_kernel(logits_ref, pboxes_ref, t_onehot_ref, t_boxesT_ref, cost_ref,
                 *, w_class, w_bbox, w_giou):
    """Matcher cost matrix [Q, Nmax] for one (layer, batch) grid cell."""
    logits = logits_ref[0, 0]      # [Q, C+1]
    pb = pboxes_ref[0, 0]          # [Q, 4]     cxcywh predictions
    toh = t_onehot_ref[0]          # [Nmax, C+1] one-hot GT labels (zero rows = padding)
    tbT = t_boxesT_ref[0]          # [4, Nmax]   GT xyxy, transposed

    eps = 1e-7
    # softmax over classes; approx reciprocal -> EUP slot (matcher needs ordering only)
    m = jnp.max(logits, axis=-1, keepdims=True)
    e = jnp.exp(logits - m)
    probs = e * pl.reciprocal(jnp.sum(e, axis=-1, keepdims=True), approx=True)
    # -p[:, tgt_class] via one-hot contraction on the MXU -> [Q, Nmax]
    # TODO(synk): at real DETR sizes (Q~300, C+1~92, N~100) cast the dot operands to
    # bf16 (keep f32 accumulation) and pad C+1 to 128 for full MXU rate.
    cost_class = -lax.dot_general(probs, toh, (((1,), (1,)), ((), ())),
                                  preferred_element_type=jnp.float32)

    # prediction columns [Q, 1]
    pcx, pcy, pw, ph = pb[:, 0:1], pb[:, 1:2], pb[:, 2:3], pb[:, 3:4]
    # target rows [1, Nmax] (xyxy -> cxcywh)
    tx1, ty1, tx2, ty2 = tbT[0:1], tbT[1:2], tbT[2:3], tbT[3:4]
    tcx, tcy = (tx1 + tx2) * 0.5, (ty1 + ty2) * 0.5
    tw, th = tx2 - tx1, ty2 - ty1

    # pairwise L1 between cxcywh vectors -> [Q, Nmax]
    cost_l1 = (jnp.abs(pcx - tcx) + jnp.abs(pcy - tcy)
               + jnp.abs(pw - tw) + jnp.abs(ph - th))

    # pairwise GIoU (pred cxcywh -> xyxy); eps guards degenerate / padded boxes
    px1, py1 = pcx - pw * 0.5, pcy - ph * 0.5
    px2, py2 = pcx + pw * 0.5, pcy + ph * 0.5
    area_p = (px2 - px1) * (py2 - py1)
    area_t = (tx2 - tx1) * (ty2 - ty1)
    ix1, iy1 = jnp.maximum(px1, tx1), jnp.maximum(py1, ty1)
    ix2, iy2 = jnp.minimum(px2, tx2), jnp.minimum(py2, ty2)
    inter = jnp.maximum(ix2 - ix1, 0.0) * jnp.maximum(iy2 - iy1, 0.0)
    union = area_p + area_t - inter
    iou = inter * pl.reciprocal(union + eps, approx=True)
    ex1, ey1 = jnp.minimum(px1, tx1), jnp.minimum(py1, ty1)
    ex2, ey2 = jnp.maximum(px2, tx2), jnp.maximum(py2, ty2)
    area_c = (ex2 - ex1) * (ey2 - ey1)
    giou = iou - (area_c - union) * pl.reciprocal(area_c + eps, approx=True)

    cost_ref[0, 0] = w_bbox * cost_l1 + w_class * cost_class + w_giou * (-giou)


def _fused_loss_kernel(logits_ref, pboxes_ref, tcls_ref, tbox_ref, mask_ref,
                       w_ref, ngt_ref, ce_ref, card_ref, l1_ref, giou_ref,
                       *, num_classes):
    """All per-layer losses (weighted CE, cardinality, box L1 sum, GIoU sum) at once."""
    logits = logits_ref[...]       # [L, B, Q, C+1]
    pb = pboxes_ref[...]           # [L, B, Q, 4]   cxcywh predictions
    tcls = tcls_ref[...]           # [L, B, Q]      int32 target class (num_classes = no-object)
    tbox = tbox_ref[...]           # [L, B, Q, 4]   xyxy GT scattered at matched positions
    msk = mask_ref[...]            # [L, B, Q]      1.0 at matched positions
    w = w_ref[...]                 # [1, 1, 1, C+1] class weights (empty_weight)
    ngt = ngt_ref[...]             # [1, B]         number of GT boxes per image

    Ld, Bd, Qd, Cp1 = logits.shape

    # ---- weighted cross-entropy (F.cross_entropy, weight, reduction='mean') ---------
    m = jnp.max(logits, axis=-1, keepdims=True)
    lse = m + jnp.log(jnp.sum(jnp.exp(logits - m), axis=-1, keepdims=True))   # [L,B,Q,1]
    cls_iota = lax.broadcasted_iota(jnp.int32, (Ld, Bd, Qd, Cp1), 3)
    oh = (cls_iota == tcls[..., None]).astype(jnp.float32)                    # [L,B,Q,C+1]
    logit_t = jnp.sum(oh * logits, axis=-1, keepdims=True)                    # [L,B,Q,1]
    nll = (lse - logit_t)[..., 0]                                             # [L,B,Q]
    w_pos = jnp.sum(oh * w, axis=-1)                                          # [L,B,Q]
    ce_num = jnp.sum(jnp.sum(w_pos * nll, axis=-1), axis=-1, keepdims=True)   # [L,1]
    ce_den = jnp.sum(jnp.sum(w_pos, axis=-1), axis=-1, keepdims=True)         # [L,1]
    ce_ref[...] = ce_num / ce_den

    # ---- cardinality error: mean_b | #(argmax != no-object) - n_gt_b | --------------
    obj_max = jnp.max(logits[..., :num_classes], axis=-1, keepdims=True)      # [L,B,Q,1]
    noobj = logits[..., num_classes:num_classes + 1]                          # [L,B,Q,1]
    nonempty = (obj_max >= noobj).astype(jnp.float32)[..., 0]                 # [L,B,Q]
    card = jnp.sum(nonempty, axis=-1)                                         # [L,B]
    card_ref[...] = jnp.mean(jnp.abs(card - ngt), axis=-1, keepdims=True)     # [L,1]

    # ---- matched-box L1 + GIoU-loss sums (masked over all B*Q positions) ------------
    eps = 1e-7  # torchvision generalized_box_iou_loss eps
    tx1, ty1, tx2, ty2 = tbox[..., 0], tbox[..., 1], tbox[..., 2], tbox[..., 3]
    tcx, tcy = (tx1 + tx2) * 0.5, (ty1 + ty2) * 0.5
    tw, th = tx2 - tx1, ty2 - ty1
    scx, scy, sw, sh = pb[..., 0], pb[..., 1], pb[..., 2], pb[..., 3]

    l1 = (jnp.abs(scx - tcx) + jnp.abs(scy - tcy)
          + jnp.abs(sw - tw) + jnp.abs(sh - th)) * msk                        # [L,B,Q]
    l1_ref[...] = jnp.sum(jnp.sum(l1, axis=-1), axis=-1, keepdims=True)       # [L,1]

    sx1, sy1 = scx - sw * 0.5, scy - sh * 0.5
    sx2, sy2 = scx + sw * 0.5, scy + sh * 0.5
    area_s = (sx2 - sx1) * (sy2 - sy1)
    area_t = (tx2 - tx1) * (ty2 - ty1)
    ix1, iy1 = jnp.maximum(sx1, tx1), jnp.maximum(sy1, ty1)
    ix2, iy2 = jnp.minimum(sx2, tx2), jnp.minimum(sy2, ty2)
    inter = jnp.maximum(ix2 - ix1, 0.0) * jnp.maximum(iy2 - iy1, 0.0)
    union = area_s + area_t - inter
    iou = inter / (union + eps)
    ex1, ey1 = jnp.minimum(sx1, tx1), jnp.minimum(sy1, ty1)
    ex2, ey2 = jnp.maximum(sx2, tx2), jnp.maximum(sy2, ty2)
    area_c = (ex2 - ex1) * (ey2 - ey1)
    giou = iou - (area_c - union) / (area_c + eps)
    giou_ref[...] = jnp.sum(jnp.sum((1.0 - giou) * msk, axis=-1),
                            axis=-1, keepdims=True)                           # [L,1]


# --------------------------------------------------------------------------------------
# Pallas call wrappers
# --------------------------------------------------------------------------------------
def compute_match_cost(logits_all, pboxes_all, onehot_pad, tboxesT_pad,
                       w_class, w_bbox, w_giou):
    """Matcher cost for all layers/batch elements in one launch -> [L, B, Q, Nmax]."""
    B, L, Q, Cp1 = logits_all.shape
    Nmax = onehot_pad.shape[1]
    kern = functools.partial(_cost_kernel, w_class=w_class, w_bbox=w_bbox, w_giou=w_giou)
    return pl.pallas_call(
        kern,
        out_shape=jax.ShapeDtypeStruct((L, B, Q, Nmax), jnp.float32),
        grid=(L, B),
        in_specs=[
            pl.BlockSpec((1, 1, Q, Cp1), lambda l, b: (b, l, 0, 0)),
            pl.BlockSpec((1, 1, Q, 4), lambda l, b: (b, l, 0, 0)),
            pl.BlockSpec((1, Nmax, Cp1), lambda l, b: (b, 0, 0)),
            pl.BlockSpec((1, 4, Nmax), lambda l, b: (b, 0, 0)),
        ],
        out_specs=pl.BlockSpec((1, 1, Q, Nmax), lambda l, b: (l, b, 0, 0)),
        compiler_params=pltpu.CompilerParams(
            dimension_semantics=("parallel", "parallel")),
    )(logits_all, pboxes_all, onehot_pad, tboxesT_pad)


def fused_losses(logits_lb, boxes_lb, tcls, tbox, mask, weight4, ngt_row, num_classes):
    """One launch computing [L,1] CE / cardinality / L1-sum / GIoU-sum."""
    # TODO(synk): at real DETR scale grid this over L (and B*Q tiles) so the full-array
    # VMEM blocks stay under v5e's 16 MiB scoped-VMEM default.
    L = logits_lb.shape[0]
    kern = functools.partial(_fused_loss_kernel, num_classes=num_classes)
    return pl.pallas_call(
        kern,
        out_shape=(jax.ShapeDtypeStruct((L, 1), jnp.float32),
                   jax.ShapeDtypeStruct((L, 1), jnp.float32),
                   jax.ShapeDtypeStruct((L, 1), jnp.float32),
                   jax.ShapeDtypeStruct((L, 1), jnp.float32)),
        in_specs=[_VMEM] * 7,
        out_specs=(_VMEM,) * 4,
    )(logits_lb, boxes_lb, tcls, tbox, mask, weight4, ngt_row)


# --------------------------------------------------------------------------------------
# Host-side Hungarian assignment
# --------------------------------------------------------------------------------------
def _assignment(cost):
    """Minimum-cost injective assignment of each GT column to a distinct prediction row."""
    Q, N = cost.shape
    if N == 0:
        return np.zeros((0,), np.int64), np.zeros((0,), np.int64)
    if _linear_sum_assignment is not None:
        r, c = _linear_sum_assignment(cost)
        return np.asarray(r, np.int64), np.asarray(c, np.int64)
    # exact brute-force fallback (fine for tiny N)
    best_c, best_rows = None, None
    for rows in itertools.permutations(range(Q), N):
        s = float(cost[list(rows), list(range(N))].sum())
        if best_c is None or s < best_c:
            best_c, best_rows = s, rows
    rows = np.asarray(best_rows, np.int64)
    cols = np.arange(N, dtype=np.int64)
    order = np.argsort(rows)
    return rows[order], cols[order]


# --------------------------------------------------------------------------------------
# SetCriterion equivalent
# --------------------------------------------------------------------------------------
class SetCriterionPallas:
    def __init__(self, num_classes, weight_label_ce=1.0, weight_bbox_l1=5.0,
                 weight_bbox_giou=2.0, eos_coef=0.1,
                 match_w_class=1.0, match_w_bbox=5.0, match_w_giou=2.0):
        self.num_classes = num_classes
        self.weight_label_ce = weight_label_ce
        self.weight_bbox_l1 = weight_bbox_l1
        self.weight_bbox_giou = weight_bbox_giou
        self.eos_coef = eos_coef
        self.match_w = (match_w_class, match_w_bbox, match_w_giou)
        ew = np.ones((1, 1, 1, num_classes + 1), np.float32)
        ew[..., -1] = eos_coef
        self.empty_weight = jnp.asarray(ew)          # deterministic buffer init

    def __call__(self, outputs, targets):
        pred_logits_all = outputs['pred_logits']     # [B, L, Q, C+1]
        pred_boxes_all = outputs['pred_boxes']       # [B, L, Q, 4]
        gt_labels = [np.asarray(t, dtype=np.int32) for t in targets['class_idx']]
        gt_boxes = [np.asarray(t, dtype=np.float32) for t in targets['boxes_normalized']]

        B, L, Q, Cp1 = pred_logits_all.shape
        n_gt = np.array([len(x) for x in gt_labels], np.int32)
        total_num_gt = max(int(n_gt.sum()), 1)
        # pad GT dim to a lane-dense multiple of 128
        Nmax = int(np.ceil(max(int(n_gt.max()), 1) / 128.0) * 128)

        onehot_pad = np.zeros((B, Nmax, Cp1), np.float32)
        tboxes_pad = np.zeros((B, Nmax, 4), np.float32)
        for b in range(B):
            n = int(n_gt[b])
            if n:
                onehot_pad[b, np.arange(n), gt_labels[b]] = 1.0
                tboxes_pad[b, :n] = gt_boxes[b]
        onehot_pad = jnp.asarray(onehot_pad)
        tboxesT_pad = jnp.asarray(np.transpose(tboxes_pad, (0, 2, 1)))  # [B, 4, Nmax]
        ngt_row = jnp.asarray(n_gt.astype(np.float32)[None, :])         # [1, B]

        # ---- matcher cost for ALL layers in one launch, one host transfer -----------
        cost_all = compute_match_cost(pred_logits_all, pred_boxes_all,
                                      onehot_pad, tboxesT_pad, *self.match_w)
        cost_np = np.asarray(cost_all)                                  # [L, B, Q, Nmax]

        # TODO(synk): Hungarian assignment (linear_sum_assignment) is a sequential
        # combinatorial algorithm with no Pallas equivalent; solved on host.
        indices = [[_assignment(cost_np[l, b, :, :int(n_gt[b])]) for b in range(B)]
                   for l in range(L)]

        # Dense per-layer matched targets built on host, uploaded once.
        target_classes = np.full((L, B, Q), self.num_classes, np.int32)
        tgt_boxes_full = np.zeros((L, B, Q, 4), np.float32)
        match_mask = np.zeros((L, B, Q), np.float32)
        for l in range(L):
            for b in range(B):
                rows, cols = indices[l][b]
                if rows.size:
                    target_classes[l, b, rows] = gt_labels[b][cols]
                    tgt_boxes_full[l, b, rows] = gt_boxes[b][cols]
                    match_mask[l, b, rows] = 1.0

        logits_lb = jnp.transpose(pred_logits_all, (1, 0, 2, 3))  # [L, B, Q, C+1]
        boxes_lb = jnp.transpose(pred_boxes_all, (1, 0, 2, 3))    # [L, B, Q, 4]

        ce, card, l1s, gious = fused_losses(
            logits_lb, boxes_lb,
            jnp.asarray(target_classes), jnp.asarray(tgt_boxes_full),
            jnp.asarray(match_mask), self.empty_weight, ngt_row, self.num_classes)

        ce = ce[:, 0] * self.weight_label_ce
        card = card[:, 0]
        l1s = l1s[:, 0] * (self.weight_bbox_l1 / total_num_gt)
        gious = gious[:, 0] * (self.weight_bbox_giou / total_num_gt)

        losses = {}
        for i in range(L):
            suffix = f'_{i}' if i < L - 1 else ''
            losses[f'loss_label_ce{suffix}'] = ce[i]
            losses[f'cardinality_error{suffix}'] = card[i]
            losses[f'loss_l1_bbox{suffix}'] = l1s[i]
            losses[f'loss_giou{suffix}'] = gious[i]

        # class_error of the last decoder layer (tiny matched gather, plain JAX)
        rows_cat = np.concatenate([indices[L - 1][b][0] for b in range(B)])
        bidx_cat = np.concatenate(
            [np.full_like(indices[L - 1][b][0], b) for b in range(B)])
        labels_cat = np.concatenate(
            [gt_labels[b][indices[L - 1][b][1]] for b in range(B)])
        if rows_cat.size:
            flat = pred_logits_all[:, L - 1].reshape(B * Q, Cp1)
            matched = flat[jnp.asarray(bidx_cat * Q + rows_cat)]
            acc = jnp.mean((jnp.argmax(matched, -1) ==
                            jnp.asarray(labels_cat)).astype(jnp.float32)) * 100.0
            losses['class_error'] = 100.0 - acc
        else:
            losses['class_error'] = jnp.asarray(0.0, jnp.float32)
        return losses


# --------------------------------------------------------------------------------------
if __name__ == "__main__":
    key = jax.random.PRNGKey(0)
    B, L, Q = 2, 2, 8            # batch, decoder layers, queries
    num_classes = 7
    Cp1 = num_classes + 1
    ks = jax.random.split(key, 8)

    pred_logits = jax.random.normal(ks[0], (B, L, Q, Cp1), jnp.float32)
    cxcy = jax.random.uniform(ks[1], (B, L, Q, 2), minval=0.25, maxval=0.75)
    wh = jax.random.uniform(ks[2], (B, L, Q, 2), minval=0.05, maxval=0.30)
    pred_boxes = jnp.concatenate([cxcy, wh], axis=-1).astype(jnp.float32)

    n_gt_list = [3, 2]
    gt_labels, gt_boxes = [], []
    for b in range(B):
        kl, kc, ksz = jax.random.split(ks[3 + b], 3)
        n = n_gt_list[b]
        gt_labels.append(np.asarray(jax.random.randint(kl, (n,), 0, num_classes),
                                    dtype=np.int32))
        c = np.asarray(jax.random.uniform(kc, (n, 2), minval=0.3, maxval=0.7))
        s = np.asarray(jax.random.uniform(ksz, (n, 2), minval=0.1, maxval=0.3))
        gt_boxes.append(np.concatenate([c - s / 2.0, c + s / 2.0], axis=1).astype(np.float32))

    criterion = SetCriterionPallas(num_classes)
    losses = criterion({'pred_logits': pred_logits, 'pred_boxes': pred_boxes},
                       {'class_idx': gt_labels, 'boxes_normalized': gt_boxes})

    for v in losses.values():
        jax.block_until_ready(jnp.asarray(v))
    print("KERNEL_OK")
</pallas_src>

<mosaic_0001>
module attributes {stable_mosaic.version = 11 : i64} {
  func.func @_cost_kernel(%arg0: i32, %arg1: i32, %arg2: memref<1x1x8x8xf32, #tpu.memory_space<vmem>>, %arg3: memref<1x1x8x4xf32, #tpu.memory_space<vmem>>, %arg4: memref<1x128x8xf32, #tpu.memory_space<vmem>>, %arg5: memref<1x4x128xf32, #tpu.memory_space<vmem>>, %arg6: memref<1x1x8x128xf32, #tpu.memory_space<vmem>>) attributes {dimension_semantics = [#tpu.dimension_semantics<parallel>, #tpu.dimension_semantics<parallel>], iteration_bounds = array<i64: 2, 2>, scalar_prefetch = 0 : i64, scratch_operands = 0 : i64, tpu.core_type = #tpu.core_type<tc>, window_params = [{transform_indices = @transform_0, window_bounds = array<i64: 1, 1, 8, 8>}, {transform_indices = @transform_1, window_bounds = array<i64: 1, 1, 8, 4>}, {transform_indices = @transform_2, window_bounds = array<i64: 1, 128, 8>}, {transform_indices = @transform_3, window_bounds = array<i64: 1, 4, 128>}, {transform_indices = @transform_4, window_bounds = array<i64: 1, 1, 8, 128>}]} {
    %c0 = arith.constant 0 : index
    %c0_0 = arith.constant 0 : index
    %c0_1 = arith.constant 0 : index
    %c0_2 = arith.constant 0 : index
    %0 = vector.load %arg2[%c0, %c0_0, %c0_1, %c0_2] : memref<1x1x8x8xf32, #tpu.memory_space<vmem>>, vector<1x1x8x8xf32>
    %1 = vector.shape_cast %0 : vector<1x1x8x8xf32> to vector<8x8xf32>
    %c0_3 = arith.constant 0 : index
    %c0_4 = arith.constant 0 : index
    %c0_5 = arith.constant 0 : index
    %c0_6 = arith.constant 0 : index
    %2 = vector.load %arg3[%c0_3, %c0_4, %c0_5, %c0_6] : memref<1x1x8x4xf32, #tpu.memory_space<vmem>>, vector<1x1x8x4xf32>
    %3 = vector.shape_cast %2 : vector<1x1x8x4xf32> to vector<8x4xf32>
    %c0_7 = arith.constant 0 : index
    %c0_8 = arith.constant 0 : index
    %c0_9 = arith.constant 0 : index
    %4 = vector.load %arg4[%c0_7, %c0_8, %c0_9] : memref<1x128x8xf32, #tpu.memory_space<vmem>>, vector<1x128x8xf32>
    %5 = vector.shape_cast %4 : vector<1x128x8xf32> to vector<128x8xf32>
    %c0_10 = arith.constant 0 : index
    %c0_11 = arith.constant 0 : index
    %c0_12 = arith.constant 0 : index
    %6 = vector.load %arg5[%c0_10, %c0_11, %c0_12] : memref<1x4x128xf32, #tpu.memory_space<vmem>>, vector<1x4x128xf32>
    %7 = vector.shape_cast %6 : vector<1x4x128xf32> to vector<4x128xf32>
    %cst = arith.constant dense<0xFF800000> : vector<8xf32>
    %8 = vector.multi_reduction <maximumf>, %1, %cst [1] : vector<8x8xf32> to vector<8xf32>
    %9 = vector.shape_cast %8 : vector<8xf32> to vector<8x1xf32>
    %10 = vector.broadcast %9 : vector<8x1xf32> to vector<8x8xf32>
    %11 = arith.subf %1, %10 : vector<8x8xf32>
    %12 = math.exp %11 : vector<8x8xf32>
    %cst_13 = arith.constant dense<0.000000e+00> : vector<8xf32>
    %13 = vector.multi_reduction <add>, %12, %cst_13 [1] : vector<8x8xf32> to vector<8xf32>
    %14 = vector.shape_cast %13 : vector<8xf32> to vector<8x1xf32>
    %15 = tpu.reciprocal %14 {approx = true} : vector<8x1xf32> -> vector<8x1xf32>
    %16 = vector.broadcast %15 : vector<8x1xf32> to vector<8x8xf32>
    %17 = arith.mulf %12, %16 : vector<8x8xf32>
    %cst_14 = arith.constant dense<0.000000e+00> : vector<8x128xf32>
    %18 = tpu.matmul %17, %5, %cst_14 {dimension_numbers = #tpu.dot_dimension_numbers<[1], [1], [0], [0], [0, 0, 1, 0], [], []>} : vector<8x8xf32>, vector<128x8xf32>, vector<8x128xf32> -> vector<8x128xf32>
    %cst_15 = arith.constant 0.000000e+00 : f32
    %19 = vector.broadcast %cst_15 : f32 to vector<8x128xf32>
    %20 = arith.subf %19, %18 : vector<8x128xf32>
    %21 = vector.extract_strided_slice %3 {offsets = [0, 0], sizes = [8, 1], strides = [1, 1]} : vector<8x4xf32> to vector<8x1xf32>
    %22 = vector.extract_strided_slice %3 {offsets = [0, 1], sizes = [8, 1], strides = [1, 1]} : vector<8x4xf32> to vector<8x1xf32>
    %23 = vector.extract_strided_slice %3 {offsets = [0, 2], sizes = [8, 1], strides = [1, 1]} : vector<8x4xf32> to vector<8x1xf32>
    %24 = vector.extract_strided_slice %3 {offsets = [0, 3], sizes = [8, 1], strides = [1, 1]} : vector<8x4xf32> to vector<8x1xf32>
    %25 = vector.extract_strided_slice %7 {offsets = [0, 0], sizes = [1, 128], strides = [1, 1]} : vector<4x128xf32> to vector<1x128xf32>
    %26 = vector.extract_strided_slice %7 {offsets = [1, 0], sizes = [1, 128], strides = [1, 1]} : vector<4x128xf32> to vector<1x128xf32>
    %27 = vector.extract_strided_slice %7 {offsets = [2, 0], sizes = [1, 128], strides = [1, 1]} : vector<4x128xf32> to vector<1x128xf32>
    %28 = vector.extract_strided_slice %7 {offsets = [3, 0], sizes = [1, 128], strides = [1, 1]} : vector<4x128xf32> to vector<1x128xf32>
    %29 = arith.addf %25, %27 : vector<1x128xf32>
    %cst_16 = arith.constant 5.000000e-01 : f32
    %30 = vector.broadcast %cst_16 : f32 to vector<1x128xf32>
    %31 = arith.mulf %29, %30 : vector<1x128xf32>
    %32 = arith.addf %26, %28 : vector<1x128xf32>
    %cst_17 = arith.constant 5.000000e-01 : f32
    %33 = vector.broadcast %cst_17 : f32 to vector<1x128xf32>
    %34 = arith.mulf %32, %33 : vector<1x128xf32>
    %35 = arith.subf %27, %25 : vector<1x128xf32>
    %36 = arith.subf %28, %26 : vector<1x128xf32>
    %37 = vector.broadcast %21 : vector<8x1xf32> to vector<8x128xf32>
    %38 = vector.broadcast %31 : vector<1x128xf32> to vector<8x128xf32>
    %39 = arith.subf %37, %38 : vector<8x128xf32>
    %40 = math.absf %39 : vector<8x128xf32>
    %41 = vector.broadcast %22 : vector<8x1xf32> to vector<8x128xf32>
    %42 = vector.broadcast %34 : vector<1x128xf32> to vector<8x128xf32>
    %43 = arith.subf %41, %42 : vector<8x128xf32>
    %44 = math.absf %43 : vector<8x128xf32>
    %45 = arith.addf %40, %44 : vector<8x128xf32>
    %46 = vector.broadcast %23 : vector<8x1xf32> to vector<8x128xf32>
    %47 = vector.broadcast %35 : vector<1x128xf32> to vector<8x128xf32>
    %48 = arith.subf %46, %47 : vector<8x128xf32>
    %49 = math.absf %48 : vector<8x128xf32>
    %50 = arith.addf %45, %49 : vector<8x128xf32>
    %51 = vector.broadcast %24 : vector<8x1xf32> to vector<8x128xf32>
    %52 = vector.broadcast %36 : vector<1x128xf32> to vector<8x128xf32>
    %53 = arith.subf %51, %52 : vector<8x128xf32>
    %54 = math.absf %53 : vector<8x128xf32>
    %55 = arith.addf %50, %54 : vector<8x128xf32>
    %cst_18 = arith.constant 5.000000e-01 : f32
    %56 = vector.broadcast %cst_18 : f32 to vector<8x1xf32>
    %57 = arith.mulf %23, %56 : vector<8x1xf32>
    %58 = arith.subf %21, %57 : vector<8x1xf32>
    %cst_19 = arith.constant 5.000000e-01 : f32
    %59 = vector.broadcast %cst_19 : f32 to vector<8x1xf32>
    %60 = arith.mulf %24, %59 : vector<8x1xf32>
    %61 = arith.subf %22, %60 : vector<8x1xf32>
    %cst_20 = arith.constant 5.000000e-01 : f32
    %62 = vector.broadcast %cst_20 : f32 to vector<8x1xf32>
    %63 = arith.mulf %23, %62 : vector<8x1xf32>
    %64 = arith.addf %21, %63 : vector<8x1xf32>
    %cst_21 = arith.constant 5.000000e-01 : f32
    %65 = vector.broadcast %cst_21 : f32 to vector<8x1xf32>
    %66 = arith.mulf %24, %65 : vector<8x1xf32>
    %67 = arith.addf %22, %66 : vector<8x1xf32>
    %68 = arith.subf %64, %58 : vector<8x1xf32>
    %69 = arith.subf %67, %61 : vector<8x1xf32>
    %70 = arith.mulf %68, %69 : vector<8x1xf32>
    %71 = arith.subf %27, %25 : vector<1x128xf32>
    %72 = arith.subf %28, %26 : vector<1x128xf32>
    %73 = arith.mulf %71, %72 : vector<1x128xf32>
    %74 = vector.broadcast %58 : vector<8x1xf32> to vector<8x128xf32>
    %75 = vector.broadcast %25 : vector<1x128xf32> to vector<8x128xf32>
    %76 = arith.maximumf %74, %75 : vector<8x128xf32>
    %77 = vector.broadcast %61 : vector<8x1xf32> to vector<8x128xf32>
    %78 = vector.broadcast %26 : vector<1x128xf32> to vector<8x128xf32>
    %79 = arith.maximumf %77, %78 : vector<8x128xf32>
    %80 = vector.broadcast %64 : vector<8x1xf32> to vector<8x128xf32>
    %81 = vector.broadcast %27 : vector<1x128xf32> to vector<8x128xf32>
    %82 = arith.minimumf %80, %81 : vector<8x128xf32>
    %83 = vector.broadcast %67 : vector<8x1xf32> to vector<8x128xf32>
    %84 = vector.broadcast %28 : vector<1x128xf32> to vector<8x128xf32>
    %85 = arith.minimumf %83, %84 : vector<8x128xf32>
    %86 = arith.subf %82, %76 : vector<8x128xf32>
    %cst_22 = arith.constant 0.000000e+00 : f32
    %87 = vector.broadcast %cst_22 : f32 to vector<8x128xf32>
    %88 = arith.maximumf %86, %87 : vector<8x128xf32>
    %89 = arith.subf %85, %79 : vector<8x128xf32>
    %cst_23 = arith.constant 0.000000e+00 : f32
    %90 = vector.broadcast %cst_23 : f32 to vector<8x128xf32>
    %91 = arith.maximumf %89, %90 : vector<8x128xf32>
    %92 = arith.mulf %88, %91 : vector<8x128xf32>
    %93 = vector.broadcast %70 : vector<8x1xf32> to vector<8x128xf32>
    %94 = vector.broadcast %73 : vector<1x128xf32> to vector<8x128xf32>
    %95 = arith.addf %93, %94 : vector<8x128xf32>
    %96 = arith.subf %95, %92 : vector<8x128xf32>
    %cst_24 = arith.constant 1.000000e-07 : f32
    %97 = vector.broadcast %cst_24 : f32 to vector<8x128xf32>
    %98 = arith.addf %96, %97 : vector<8x128xf32>
    %99 = tpu.reciprocal %98 {approx = true} : vector<8x128xf32> -> vector<8x128xf32>
    %100 = arith.mulf %92, %99 : vector<8x128xf32>
    %101 = vector.broadcast %58 : vector<8x1xf32> to vector<8x128xf32>
    %102 = vector.broadcast %25 : vector<1x128xf32> to vector<8x128xf32>
    %103 = arith.minimumf %101, %102 : vector<8x128xf32>
    %104 = vector.broadcast %61 : vector<8x1xf32> to vector<8x128xf32>
    %105 = vector.broadcast %26 : vector<1x128xf32> to vector<8x128xf32>
    %106 = arith.minimumf %104, %105 : vector<8x128xf32>
    %107 = vector.broadcast %64 : vector<8x1xf32> to vector<8x128xf32>
    %108 = vector.broadcast %27 : vector<1x128xf32> to vector<8x128xf32>
    %109 = arith.maximumf %107, %108 : vector<8x128xf32>
    %110 = vector.broadcast %67 : vector<8x1xf32> to vector<8x128xf32>
    %111 = vector.broadcast %28 : vector<1x128xf32> to vector<8x128xf32>
    %112 = arith.maximumf %110, %111 : vector<8x128xf32>
    %113 = arith.subf %109, %103 : vector<8x128xf32>
    %114 = arith.subf %112, %106 : vector<8x128xf32>
    %115 = arith.mulf %113, %114 : vector<8x128xf32>
    %116 = arith.subf %115, %96 : vector<8x128xf32>
    %cst_25 = arith.constant 1.000000e-07 : f32
    %117 = vector.broadcast %cst_25 : f32 to vector<8x128xf32>
    %118 = arith.addf %115, %117 : vector<8x128xf32>
    %119 = tpu.reciprocal %118 {approx = true} : vector<8x128xf32> -> vector<8x128xf32>
    %120 = arith.mulf %116, %119 : vector<8x128xf32>
    %121 = arith.subf %100, %120 : vector<8x128xf32>
    %cst_26 = arith.constant 5.000000e+00 : f32
    %122 = vector.broadcast %cst_26 : f32 to vector<8x128xf32>
    %123 = arith.mulf %122, %55 : vector<8x128xf32>
    %cst_27 = arith.constant 1.000000e+00 : f32
    %124 = vector.broadcast %cst_27 : f32 to vector<8x128xf32>
    %125 = arith.mulf %124, %20 : vector<8x128xf32>
    %126 = arith.addf %123, %125 : vector<8x128xf32>
    %cst_28 = arith.constant 0.000000e+00 : f32
    %127 = vector.broadcast %cst_28 : f32 to vector<8x128xf32>
    %128 = arith.subf %127, %121 : vector<8x128xf32>
    %cst_29 = arith.constant 2.000000e+00 : f32
    %129 = vector.broadcast %cst_29 : f32 to vector<8x128xf32>
    %130 = arith.mulf %129, %128 : vector<8x128xf32>
    %131 = arith.addf %126, %130 : vector<8x128xf32>
    %c0_30 = arith.constant 0 : index
    %c0_31 = arith.constant 0 : index
    %c0_32 = arith.constant 0 : index
    %c0_33 = arith.constant 0 : index
    %132 = vector.load %arg6[%c0_30, %c0_31, %c0_32, %c0_33] : memref<1x1x8x128xf32, #tpu.memory_space<vmem>>, vector<1x1x8x128xf32>
    %133 = vector.shape_cast %132 : vector<1x1x8x128xf32> to vector<8x128xf32>
    %134 = vector.shape_cast %131 : vector<8x128xf32> to vector<1x1x8x128xf32>
    tpu.vector_store %arg6[%c0_30, %c0_31, %c0_32, %c0_33], %134 {strides = array<i32>} : memref<1x1x8x128xf32, #tpu.memory_space<vmem>>, vector<1x1x8x128xf32>,
    return
  }
  func.func @transform_0(%arg0: i32, %arg1: i32) -> (i32, i32, i32, i32) {
    %c0_i32 = arith.constant 0 : i32
    %c0_i32_0 = arith.constant 0 : i32
    %c0_i32_1 = arith.constant 0 : i32
    return %arg1, %arg0, %c0_i32, %c0_i32_0 : i32, i32, i32, i32
  }
  func.func @transform_1(%arg0: i32, %arg1: i32) -> (i32, i32, i32, i32) {
    %c0_i32 = arith.constant 0 : i32
    %c0_i32_0 = arith.constant 0 : i32
    %c0_i32_1 = arith.constant 0 : i32
    return %arg1, %arg0, %c0_i32, %c0_i32_0 : i32, i32, i32, i32
  }
  func.func @transform_2(%arg0: i32, %arg1: i32) -> (i32, i32, i32) {
    %c0_i32 = arith.constant 0 : i32
    %c0_i32_0 = arith.constant 0 : i32
    %c0_i32_1 = arith.constant 0 : i32
    return %arg1, %c0_i32, %c0_i32_0 : i32, i32, i32
  }
  func.func @transform_3(%arg0: i32, %arg1: i32) -> (i32, i32, i32) {
    %c0_i32 = arith.constant 0 : i32
    %c0_i32_0 = arith.constant 0 : i32
    %c0_i32_1 = arith.constant 0 : i32
    return %arg1, %c0_i32, %c0_i32_0 : i32, i32, i32
  }
  func.func @transform_4(%arg0: i32, %arg1: i32) -> (i32, i32, i32, i32) {
    %c0_i32 = arith.constant 0 : i32
    %c0_i32_0 = arith.constant 0 : i32
    %c0_i32_1 = arith.constant 0 : i32
    return %arg0, %arg1, %c0_i32, %c0_i32_0 : i32, i32, i32, i32
  }
}

</mosaic_0001>

<bundles_post_ra>
// kernel: tpu_custom_call.1
= control target key start
LH: loop header
LB: loop body
LE: loop exit
PB: predicated region body
PF: predicated region fallthrough
CT: control target
= control target key end

     0   :  { %9 = vsyncpa [#allocation3], 0  ;;  %s1275_s0 = inlined_call_operand.vmem [shape: f32[2,2,8,8], index: 0, kind: input, shape index: {}]   ;;  %s1276_s1 = inlined_call_operand.vmem [shape: f32[2,2,8,4], index: 1, kind: input, shape index: {}]   ;;  %s1277_s2 = inlined_call_operand.vmem [shape: f32[2,128,8], index: 2, kind: input, shape index: {}]   ;;  %s1278_s3 = inlined_call_operand.vmem [shape: f32[2,4,128], index: 3, kind: input, shape index: {}]   ;;  %s1279_s4 = inlined_call_operand.hbm [shape: f32[2,2,8,128], index: 4, kind: output, shape index: {}]  }
   0x1   :  { %11 = vsyncpa [#allocation3 + $0x1], 0  ;;  %s1069_s15 = smov 0   ;;  %s1071_s16 = smov 0  }
   0x2   :  { %s1073_s17 = smov 0   ;;  %s1075_s18 = smov 0  }
   0x3   :  { %s1077_s19 = smov 0   ;;  %s1079_s20 = smov 0  }
   0x4   :  { %s1081_s21 = smov 0   ;;  %s1083_s22 = smov 0  }
   0x5 LB: > { %s722_s23 = sadd.s32 4294967295, %s1032_s22   ;;  %s723_s24 = sadd.s32 4294967294, %s1032_s22   ;;  %s1032_s22 = sphi %s1083_s22, %s17_s22   ;;  %s1028_s21 = sphi %s1081_s21, %s1290_s21   ;;  %s1024_s20 = sphi %s1079_s20, %s1289_s20   ;;  %s1020_s19 = sphi %s1077_s19, %s1288_s19   ;;  %s1016_s18 = sphi %s1075_s18, %s1287_s18   ;;  %s1012_s17 = sphi %s1073_s17, %s1286_s17   ;;  %s1008_s16 = sphi %s1071_s16, %s1285_s16   ;;  %s1004_s15 = sphi %s1069_s15, %s1284_s15  }
   0x6   : > { %s26_s25 = sadd.s32 1, %s1024_s20  ;;  %s29_s26 = sadd.s32 1, %s1028_s21 }
   0x7   : > { %p27_p0 = scmp.ge.s32.totalorder %s26_s25, 2  ;;  %p156_p1 = scmp.ne.s32.totalorder %s1012_s17, %s1008_s16 }
   0x8   : > { %p157_p2 = scmp.eq.s32.totalorder %s722_s23, 3  ;;  %p162_p5 = scmp.ne.s32.totalorder %s1008_s16, %s1004_s15 }
   0x9   : > { %s1292_s25 = smov (%p27_p0, %s26_s25), 0  ;;  %s1294_s26 = smov (!%p27_p0, %s29_s26), %s1028_s21 }
   0xa   : > { %s142_s27 = ssub.s32 %s1024_s20, %s1292_s25  ;;  %p1120_p3 = por %p157_p2, %p156_p1 }
   0xb   : > { %p31_p4 = scmp.ge.s32.totalorder %s1294_s26, 2  ;;  %p163_p6 = scmp.eq.s32.totalorder %s723_s24, 3 }
   0xc   : > { %p726_p7 = scmp.ge.s32.totalorder %s1032_s22, 1  ;;  %p218_p9 = scmp.lt.s32.totalorder %s1032_s22, 5 }
   0xd   : > { %s1296_s26 = smov (%p31_p4, %s1294_s26), 0  ;;  %p1129_p8 = por %p163_p6, %p162_p5 }
   0xe   : > { %s141_s30 = ssub.s32 %s1028_s21, %s1296_s26  ;;  %s146_s5 = sadd.s32 1, %s1012_s17 }
   0xf   : > { %s143_s6 = sor.u32 %s142_s27, %s141_s30  ;;  %p219_p10 = pnand %p726_p7, %p218_p9 }
  0x10   : > { %p144_p11 = scmp.eq.s32.totalorder %s143_s6, 0  ;;  %p264_p12 = scmp.lt.s32.totalorder (!%p219_p10), %s1016_s18, 1  ;;  %vm308_vm0 = vcmask (!%p219_p10), 64512   ;;  %v1035_v4 = vmov (!%p219_p10), 1   ;;  %v1036_v5 = vmov (!%p219_p10), 0   ;;  %v1037_v9 = vmov (!%p219_p10), 0.0|0.0  }
  0x11   : > { %222 = sbr.rel (%p219_p10) target bundleno = 577 (0x241), region = 36  ;;  %p266_p13 = scmp.lt.s32.totalorder (!%p219_p10), %s1020_s19, 1  ;;  %923 = vset.pattern.permute.xlu1 (!%p219_p10), %v1035_v4  ;;  %922 = vset.pattern.permute.xlu0 (!%p219_p10), %v1036_v5  ;;  %vm1166_vm1 = vmpackc.low (!%p219_p10), %vm308_vm0, %vm308_vm0  ;;  %vm1039_vm2 = vmmov (!%p219_p10), 0   ;;  %v1040_v41 = vmov (!%p219_p10), 0.0   ;;  %v1041_v44 = vmov (!%p219_p10), 2   ;;  %v1042_v45 = vmov (!%p219_p10), 3  }
  0x12   : > { %s1138_s7 = scalar_select %p144_p11, %s1012_s17, %s146_s5  }
  0x13   : > { %s1034_s5 = smov (!%p219_p10), 126   ;;  %810 = vmatprep.subr.bf16.mxu0 (!%p219_p10), %v1037_v9  ;;  %807 = vmatprep.mubr.msk.f32.mxu0 (!%p219_p10), %vm1039_vm2, %v1040_v41  ;;  %v455_v49 = vlaneseq (!%p219_p10)  ;;  %s1043_s14 = smov (!%p219_p10), [#allocation2]  }
  0x15   : > { %v456_v52 = vshrl.u32 (!%p219_p10), %v455_v49, 7 }
  0x17   : > { %v467_v55 = vsub.s32 (!%p219_p10), 1, %v456_v52  ;;  %v478_v56 = vsub.s32 (!%p219_p10), 2, %v456_v52  ;;  %v489_v57 = vsub.s32 (!%p219_p10), 3, %v456_v52  ;;  %v457_v58 = vsub.s32 (!%p219_p10), 0, %v456_v52 }
  0x18   : > { %s1143_s8 = scalar_select %p264_p12, %s1016_s18, 1 }
  0x19   : > { %s267_s9 = scalar_select %p266_p13, %s1020_s19, 1 }
  0x1a   : > { %s728_s10 = sshll.u32 %s1143_s8, 1  ;;  %s757_s6 = sshll.u32 %s1143_s8, 7 }
  0x1b   : > { %s269_s11 = sadd.s32 %s728_s10, %s267_s9  ;;  %s734_s13 = sshll.u32 %s1143_s8, 2 }
  0x1c   : > { %s729_s12 = sshll.u32 %s269_s11, 3  ;;  %s1162_s11 = scalar_lea.vmem %s1277_s2, %s757_s6 }
  0x1d   : > { %s271_s23 = scalar_lea.vmem %s1275_s0, %s729_s12  ;;  %s279_s30 = scalar_lea.vmem %s1276_s1, %s729_s12  ;;  %v291_v7 = vld [vmem:[%s1162_s11] sm:$0xff]  ;;  %v292_v8 = vld [vmem:[%s1162_s11 + $0x8] sm:$0xff]  ;;  %v293_v11 = vld [vmem:[%s1162_s11 + $0x10] sm:$0xff] }
  0x1e   : > { %v289_v0 = vld [vmem:[%s271_s23] sm:$0xff]  ;;  %v811_v10 = vpack.c.bf16 %v292_v8, %v291_v7  ;;  %v294_v12 = vld [vmem:[%s1162_s11 + $0x18] sm:$0xff]  ;;  %s1038_s12 = smov 127   ;;  %v296_v19 = vld [vmem:[%s1162_s11 + $0x28] sm:$0xff]  ;;  %s288_s24 = scalar_lea.vmem %s1278_s3, %s734_s13 }
  0x1f   : > { %v1153_v1 = vld [vmem:[%s279_s30] sm:$0xff]  ;;  %v309_v2 = vsel %vm308_vm0, %v289_v0, -inf  ;;  %v815_v16 = vpack.c.bf16 %v294_v12, %v293_v11  ;;  %v297_v21 = vld [vmem:[%s1162_s11 + $0x30] sm:$0xff]  ;;  %v298_v22 = vld [vmem:[%s1162_s11 + $0x38] sm:$0xff]  ;;  %s261_s8 = sand.u32 1, %s1008_s16   ;;  %s753_s30 = sshll.u32 %s1020_s19, 1 }
  0x20   : > { %v494_v3 = vmul.f32 0.5, %v1153_v1  ;;  %310 = vmax.xlane.f32.xlu0 %v309_v2  ;;  %813 = vmatpush3.bf16.xpose.msk.msra.mxu0 %vm1166_vm1, %v811_v10  ;;  %v295_v18 = vld [vmem:[%s1162_s11 + $0x20] sm:$0xff]  ;;  %v823_v23 = vpack.c.bf16 %v298_v22, %v297_v21  ;;  %v300_v25 = vld [vmem:[%s1162_s11 + $0x48] sm:$0xff]  ;;  %v301_v30 = vld [vmem:[%s1162_s11 + $0x50] sm:$0xff]  ;;  %s727_s27 = sshll.u32 %s261_s8, 3  ;;  %s942_s23 = sshll.u32 %s1043_s14, 4  ;;  %s943_s23 = int_to_ptr.vmem [resolvable:$false] %s942_s23 }
  0x21   : > { %814 = vmatprep.subr.bf16.mxu0 %v1037_v9  ;;  %v819_v20 = vpack.c.bf16 %v296_v19, %v295_v18  ;;  %v299_v24 = vld [vmem:[%s1162_s11 + $0x40] sm:$0xff]  ;;  %v302_v31 = vld [vmem:[%s1162_s11 + $0x58] sm:$0xff]  ;;  %v304_v34 = vld [vmem:[%s1162_s11 + $0x68] sm:$0xff]  ;;  %s263_s9 = scalar_lea.vmem [#allocation2], %s727_s27 }
  0x22   : > { %496 = vrot.lane.b32.xlu1 %v494_v3, %s1034_s5  ;;  %v827_v26 = vpack.c.bf16 %v300_v25, %v299_v24  ;;  %v831_v32 = vpack.c.bf16 %v302_v31, %v301_v30  ;;  %v303_v33 = vld [vmem:[%s1162_s11 + $0x60] sm:$0xff]  ;;  %v305_v38 = vld [vmem:[%s1162_s11 + $0x70] sm:$0xff]  ;;  %v306_v39 = vld [vmem:[%s1162_s11 + $0x78] sm:$0xff]  ;;  %s598_s5 = sadd.s32 %s1016_s18, %s753_s30  ;;  %s602_s10 = sshll.u32 %s263_s9, 4  ;;  %s1224_s10 = int_to_ptr.vmem [resolvable:$true] %s602_s10 }
  0x23   : > { %v835_v36 = vpack.c.bf16 %v304_v34, %v303_v33  ;;  %v839_v40 = vpack.c.bf16 %v306_v39, %v305_v38  ;;  %v307_v51 = vld [vmem:[%s288_s24] sm:$0xf]  ;;  %s754_s6 = sshll.u32 %s598_s5, 7  ;;  %s587_s18 = scalar_lea.sflag [#allocation3], %s261_s8 }
  0x24   : > { %v447_v54 = vrot.slane %v307_v51, 6  ;;  %v528_v60 = vrot.slane %v307_v51, %v467_v55  ;;  %v538_v61 = vrot.slane %v307_v51, %v478_v56  ;;  %v547_v62 = vrot.slane %v307_v51, %v489_v57  ;;  %s1222_s13 = scalar_lea.hbm %s1279_s4, %s754_s6  ;;  %s938_s19 = scalar_lea.vmem %s1224_s10, 128 }
  0x25   : > { %v519_v63 = vrot.slane %v307_v51, %v457_v58  ;;  %p939_p0 = scmp.ne.s32.totalorder %s1224_s10, %s938_s19  ;;  %s944_s24 = scalar_lea.vmem %s943_s23, 256 }
  0x26   : > { %v449_v59 = vsub.f32 %v307_v51, %v447_v54  ;;  %p945_p4 = scmp.lt.s32.totalorder %s1224_s10, %s943_s23  ;;  %p946_p5 = scmp.lt.s32.totalorder %s944_s24, %s938_s19 }
  0x27   : > { %p940_p1 = pnand %p939_p0, %p1120_p3 }
  0x28   : > { %817 = vmatpush3.bf16.xpose.msk.msra.mxu0 %vm1166_vm1, %v815_v16  ;;  %v508_v2 = vrot.slane %v449_v59, 1  ;;  %p947_p6 = por %p946_p5, %p945_p4 }
  0x29   : > { %818 = vmatprep.subr.bf16.mxu0 %v1037_v9  ;;  %p941_p2 = pneg %p940_p1 }
  0x2b   : > { %p948_p7 = pnand %p947_p6, %p941_p2 }
  0x30   : > { %821 = vmatpush3.bf16.xpose.msk.msra.mxu0 %vm1166_vm1, %v819_v20  ;;  %v443_v20 = vrot.slane %v307_v51, 2 }
  0x31   : > { %822 = vmatprep.subr.bf16.mxu0 %v1037_v9 }
  0x32   : > { %v445_v25 = vadd.f32 %v443_v20, %v307_v51 }
  0x38   : > { %825 = vmatpush3.bf16.xpose.msk.msra.mxu0 %vm1166_vm1, %v823_v23 }
  0x39   : > { %826 = vmatprep.subr.bf16.mxu0 %v1037_v9 }
  0x40   : > { %829 = vmatpush3.bf16.xpose.msk.msra.mxu0 %vm1166_vm1, %v827_v26 }
  0x41   : > { %830 = vmatprep.subr.bf16.mxu0 %v1037_v9 }
  0x48   : > { %833 = vmatpush3.bf16.xpose.msk.msra.mxu0 %vm1166_vm1, %v831_v32 }
  0x49   : > { %834 = vmatprep.subr.bf16.mxu0 %v1037_v9 }
  0x50   : > { %837 = vmatpush3.bf16.xpose.msk.msra.mxu0 %vm1166_vm1, %v835_v36  ;;  %v479_v36 = vrot.slane %v449_v59, %v478_v56 }
  0x51   : > { %838 = vmatprep.subr.bf16.mxu0 %v1037_v9  ;;  %v510_v9 = vmul.f32 %v508_v2, %v449_v59 }
  0x53   : > { %v562_v16 = vrot.slane %v510_v9, %v478_v56 }
  0x58   : > { %841 = vmatpush3.bf16.xpose.msk.msra.mxu0 %vm1166_vm1, %v839_v40  ;;  %v490_v40 = vrot.slane %v449_v59, %v489_v57 }
  0x94   : > { %v497_v13 = vpop.permute.xlu1 %496 }
  0x95   : > { %v499_v14 = vsub.f32 %v1153_v1, %v497_v13  ;;  %v500_v15 = vadd.f32 %v497_v13, %v1153_v1 }
  0x97   : > { %v501_v17 = vsub.f32 %v500_v15, %v499_v14 }
  0x99   : > { %503 = vrot.lane.b32.xlu1 %v501_v17, %s1038_s12 }
  0x9d   : > { %522 = vperm.xlu1 %923, %v499_v14  }
  0xa1   : > { %924 = vset.pattern.permute.xlu1 %v1036_v5 }
  0xa2   : > { %532 = vperm.xlu1 %924, %v500_v15  }
  0xa6   : > { %925 = vset.pattern.permute.xlu1 %v1035_v4 }
  0xa7   : > { %541 = vperm.xlu1 %925, %v500_v15  }
  0xab   : > { %926 = vset.pattern.permute.xlu1 %v1036_v5 }
  0xad   : > { %v311_v27 = vpop.xlane.xlu0 %310 }
  0xae   : > { %v312_v28 = vsub.f32 %v289_v0, %v311_v27 }
  0xb0   : > { %v313_v29 = vmul.f32 1.442695, %v312_v28  ;;  %v446_v28 = vmul.f32 0.5, %v445_v25 }
  0xb2   : > { %930 = vpow2.f32 %v313_v29  ;;  %v458_v31 = vrot.slane %v446_v28, %v457_v58  ;;  %v468_v32 = vrot.slane %v446_v28, %v467_v55 }
  0xbc   : > { %v931_v35 = vpop.eup %930 }
  0xbd   : > { %v315_v37 = vsel %vm308_vm0, %v931_v35, 0.0 }
  0xbe   : > { %316 = vadd.xlane.f32.xlu0 %v315_v37 }
  0xd4   : > { %513 = vperm.xlu0 %922, %v499_v14  }
 0x10b   : > { %v504_v42 = vpop.permute.xlu1 %503 }
 0x10c   : > { %v506_v43 = vmul.f32 %v504_v42, %v501_v17 }
 0x10e   : > { %556 = vperm.xlu1 %926, %v506_v43  }
 0x112   : > { %452 = vperm.xlu1 %926, %v1153_v1  }
 0x116   : > { %927 = vset.pattern.permute.xlu1 %v1035_v4 }
 0x117   : > { %462 = vperm.xlu1 %927, %v1153_v1  }
 0x11b   : > { %928 = vset.pattern.permute.xlu1 %v1041_v44 }
 0x11c   : > { %473 = vperm.xlu1 %928, %v1153_v1   ;;  %v523_v50 = vpop.permute.xlu1 %522 }
 0x11d   : > { %v529_v3 = vmax.f32 %v523_v50, %v528_v60  ;;  %v569_v10 = vmin.f32 %v523_v50, %v528_v60 }
 0x120   : > { %929 = vset.pattern.permute.xlu1 %v1042_v45 }
 0x121   : > { %484 = vperm.xlu1 %929, %v1153_v1   ;;  %v533_v53 = vpop.permute.xlu1 %532 }
 0x122   : > { %v539_v4 = vmin.f32 %v533_v53, %v538_v61  ;;  %v570_v11 = vmax.f32 %v533_v53, %v538_v61 }
 0x126   : > { %v542_v0 = vpop.permute.xlu1 %541 }
 0x127   : > { %v548_v5 = vmin.f32 %v542_v0, %v547_v62  ;;  %v571_v12 = vmax.f32 %v542_v0, %v547_v62 }
 0x129   : > { %v551_v7 = vsub.f32 %v548_v5, %v529_v3  ;;  %v573_v18 = vsub.f32 %v571_v12, %v569_v10 }
 0x12b   : > { %v552_v14 = vmax.f32 %v551_v7, 0.0 }
 0x14b   : > { %v317_v46 = vpop.xlane.xlu0 %316 }
 0x14c   : > { %932 = vrcp.f32 %v317_v46 }
 0x153   : > { %v514_v1 = vpop.permute.xlu0 %513 }
 0x154   : > { %v520_v6 = vmax.f32 %v514_v1, %v519_v63  ;;  %v568_v13 = vmin.f32 %v514_v1, %v519_v63 }
 0x156   : > { %v933_v47 = vpop.eup %932  ;;  %v549_v8 = vsub.f32 %v539_v4, %v520_v6  ;;  %v572_v19 = vsub.f32 %v570_v11, %v568_v13 }
 0x157   : > { %v319_v48 = vmul.f32 %v933_v47, %v931_v35 }
 0x158   : > { %v550_v15 = vmax.f32 %v549_v8, 0.0  ;;  %v574_v24 = vmul.f32 %v573_v18, %v572_v19 }
 0x159   : > { %808 = vmatmul.mubr.msk.f32.vlgmr.msra.gmra.mrb[0].mxu0 %vm308_vm0, %v319_v48 }
 0x15a   : > { %v553_v21 = vmul.f32 %v552_v14, %v550_v15  ;;  %v576_v27 = vadd.f32 1e-07, %v574_v24 }
 0x15c   : > { %934 = vrcp.f32 %v576_v27 }
 0x166   : > { %v935_v42 = vpop.eup %934 }
 0x18d   : > { %v557_v17 = vpop.permute.xlu1 %556 }
 0x18e   : > { %v563_v22 = vadd.f32 %v562_v16, %v557_v17 }
 0x190   : > { %v564_v26 = vsub.f32 %v563_v22, %v553_v21 }
 0x191   : > { %v453_v23 = vpop.permute.xlu1 %452 }
 0x192   : > { %v565_v29 = vadd.f32 1e-07, %v564_v26  ;;  %v459_v34 = vsub.f32 %v453_v23, %v458_v31  ;;  %v575_v43 = vsub.f32 %v574_v24, %v564_v26 }
 0x194   : > { %936 = vrcp.f32 %v565_v29  ;;  %v460_v37 = vand.u32 2147483647, %v459_v34  ;;  %v578_v49 = vmul.f32 %v935_v42, %v575_v43 }
 0x196   : > { %v463_v30 = vpop.permute.xlu1 %462 }
 0x197   : > { %v469_v35 = vsub.f32 %v463_v30, %v468_v32 }
 0x199   : > { %v470_v38 = vand.u32 2147483647, %v469_v35 }
 0x19b   : > { %v474_v33 = vpop.permute.xlu1 %473  ;;  %v471_v45 = vadd.f32 %v470_v38, %v460_v37 }
 0x19c   : > { %v480_v39 = vsub.f32 %v474_v33, %v479_v36 }
 0x19e   : > { %v937_v44 = vpop.eup %936  ;;  %v481_v46 = vand.u32 2147483647, %v480_v39 }
 0x19f   : > { %v567_v48 = vmul.f32 %v937_v44, %v553_v21 }
 0x1a0   : > { %v485_v41 = vpop.permute.xlu1 %484  ;;  %v482_v50 = vadd.f32 %v481_v46, %v471_v45 }
 0x1a1   : > { %v491_v47 = vsub.f32 %v485_v41, %v490_v40  ;;  %v579_v52 = vsub.f32 %v567_v48, %v578_v49 }
 0x1a3   : > { %v492_v51 = vand.u32 2147483647, %v491_v47  ;;  %v582_v54 = vsub.f32 0.0, %v579_v52 }
 0x1a5   : > { %v493_v53 = vadd.f32 %v492_v51, %v482_v50  ;;  %v583_v60 = vmul.f32 2.0, %v582_v54 }
 0x1a7   : > { %v580_v56 = vmul.f32 5.0, %v493_v53 }
 0x22c   : > { %v437_v55 = vpop.f32.mrb[0].mxu0 }
 0x22d   : > { %v441_v57 = vsub.f32 0.0, %v437_v55  ;;  %v809_v58 = vpop.f32.mrb[1].mxu0 }
 0x22f   : > { %v581_v59 = vadd.f32 %v580_v56, %v441_v57 }
 0x231   : > { %v584_v61 = vadd.f32 %v583_v60, %v581_v59 }
 0x233   : > { %585 = vst [vmem:[%s263_s9] sm:$0xff] %v584_v61 }
 0x234   : > { %951 = shalt.err (!%p948_p7)
}
 0x235   : > { %s952_s8 = scalar_lea.hbm %s1222_s13, 128  ;;  %s956_s5 = scalar_lea.hbm %s1279_s4, 512 }
 0x236   : > { %p953_p9 = scmp.ne.s32.totalorder %s1222_s13, %s952_s8  ;;  %p957_p12 = scmp.lt.u32.totalorder %s1222_s13, %s1279_s4 }
 0x237   : > { %p958_p13 = scmp.lt.u32.totalorder %s956_s5, %s952_s8  ;;  %p960_p1 = scmp.lt.u32.totalorder %s952_s8, %s1222_s13 }
 0x238   : > { %p954_p10 = pnand %p953_p9, %p1120_p3 }
 0x239   : > { %p959_p0 = por %p958_p13, %p957_p12 }
 0x23a   : > { %p955_p11 = pneg %p954_p10 }
 0x23b   : > { %p961_p2 = por %p960_p1, %p959_p0 }
 0x23d   : > { %p962_p4 = pnand %p961_p2, %p955_p11 }
 0x23f   : > { %965 = shalt.err (!%p962_p4)
}
 0x240   : > { %842 = dma.vmem_to_hbm [thread:$0]  (%p1120_p3), %s1224_s10, 128, %s1222_s13, %s587_s18  }
 0x241 PF: > { %p848_p5 = scmp.ge.s32.totalorder %s1032_s22, 2  ;;  %s614_s11 = sand.u32 1, %s1004_s15  }
 0x242   : > { %s615_s12 = scalar_lea.sflag [#allocation3], %s614_s11 }
 0x243   : > { %p845_p6 = pnand %p848_p5, %p1129_p8 }
 0x245   : > { %999 = dma.done.wait (!%p845_p6), %s615_s12, 128  }
 0x246   : > { %1001 = vsyncadd (!%p845_p6), %s615_s12, 4294967168  ;;  %s17_s22 = sadd.s32 1, %s1032_s22   ;;  %s1284_s15 = smov %s1008_s16 }
 0x247   : > { %p14_p7 = scmp.ge.s32.totalorder %s17_s22, 6   ;;  %s1285_s16 = smov %s1012_s17 }
 0x248   : > { %s1286_s17 = smov %s1138_s7  ;;  %s1287_s18 = smov %s1024_s20 }
 0x249   : > { %s1288_s19 = smov %s1028_s21  ;;  %s1289_s20 = smov %s1292_s25 }
 0x24a   : > { %s1290_s21 = smov %s1296_s26  ;;  %16 = sbr.rel (!%p14_p7) target bundleno = 5 (0x5), region = 80 }
 0x251   :  { %620 = vsyncpa [#allocation3], 1 }
 0x252   :  { %622 = vsyncpa [#allocation3 + $0x1], 1 }

</bundles_post_ra>
